<compile_context>
chip_gen: v5e
topology: v5e:2x2
jax: 0.10.0
libtpu: 0.0.40
codegen_flags: <defaults>
</compile_context>

<pallas_src>
import functools

import jax
import jax.numpy as jnp
from jax import lax
from jax.experimental import pallas as pl
from jax.experimental.pallas import tpu as pltpu

C_PAD = 128  # all internal activations / weights are padded to 128 channels


# ------------------------- pltpu.roll direction probe ----------------------- #

_ROLL_LIKE_JNP = None


def _roll_like_jnp():
    """True iff pltpu.roll matches jnp.roll (result[i] = x[i - shift]).
    Detected once with a tiny probe kernel so the shifted-row conv taps are
    correct regardless of the lowering's rotation convention."""
    global _ROLL_LIKE_JNP
    if _ROLL_LIKE_JNP is None:
        def k(x_ref, o_ref):
            o_ref[...] = pltpu.roll(x_ref[...], 1, axis=0)

        x = jnp.arange(8 * 128, dtype=jnp.float32).reshape(8, 128)
        y = pl.pallas_call(
            k, out_shape=jax.ShapeDtypeStruct((8, 128), jnp.float32))(x)
        _ROLL_LIKE_JNP = bool(y[0, 0] == x[7, 0])
    return _ROLL_LIKE_JNP


def _shift_rows(v, offset):
    """result[i] = v[(i + offset) % M] along axis 0 (offset is a static int)."""
    m = v.shape[0]
    off = offset % m
    if off == 0:
        return v
    shift = (m - off) if _roll_like_jnp() else off
    return pltpu.roll(v, shift, axis=0)


# --------------------------- in-kernel conv helpers ------------------------- #

def _div_mod(x, d):
    """Integer div/mod of an int32 array by a static positive Python int."""
    if d & (d - 1) == 0:                       # power of two -> shift / and
        return x >> (d.bit_length() - 1), x & (d - 1)
    return x // d, x % d


def _tap_masks(m, ho, wo):
    """Boolean (M, 1) validity masks, one per 3x3 tap (a, b), for row-major
    (image, h, w) flattened activations.  Taps that only ever read the zero
    padding (|a| >= ho or |b| >= wo) are omitted.  Built ONCE per geometry."""
    row = lax.broadcasted_iota(jnp.int32, (m, 1), 0)
    hw, w_idx = _div_mod(row, wo)
    _, h_idx = _div_mod(hw, ho)
    masks = {}
    for a in (-1, 0, 1):
        for b in (-1, 0, 1):
            if abs(a) >= ho or abs(b) >= wo:
                continue
            masks[(a, b)] = ((h_idx + a >= 0) & (h_idx + a < ho) &
                             (w_idx + b >= 0) & (w_idx + b < wo))
    return masks


def _conv_masks(m, ho, wo):
    """f32 multiply-masks (hoisted) used by every 3x3 conv at this geometry."""
    return {k: v.astype(jnp.float32) for k, v in _tap_masks(m, ho, wo).items()}


# ------------------------------ fused kernel -------------------------------- #

def _fused_encoder_kernel(patches_ref, stem_w_ref, stem_b_ref,
                          s_pool_ref, s2_ref, s3_ref, s4_ref,
                          w3_ref, b3_ref, wd_ref, bd_ref,
                          x0_ref, x1_ref, x2_ref, x3_ref, x4_ref,
                          *, n_img, hw0):
    c = C_PAD
    neg = jnp.finfo(jnp.float32).min

    # ---- stem: 7x7/s2 conv (pre-im2col'd patches) + folded-BN bias + ReLU ---
    x0 = jnp.dot(patches_ref[...], stem_w_ref[...],
                 preferred_element_type=jnp.float32) + stem_b_ref[...]
    x0 = jnp.maximum(x0, 0.0)
    x0_ref[...] = x0

    # ---- 3x3/s2/p1 maxpool: stride-1 window max via shifted rows, then a
    #      one-hot stride-2 row-selection matmul ------------------------------
    pooled = x0
    for (a, b), mk in _tap_masks(n_img * hw0 * hw0, hw0, hw0).items():
        if (a, b) == (0, 0):
            continue
        pooled = jnp.maximum(pooled,
                             jnp.where(mk, _shift_rows(x0, a * hw0 + b), neg))
    x = jnp.dot(s_pool_ref[...], pooled.astype(jnp.bfloat16),
                preferred_element_type=jnp.float32)      # layer1 input rows

    # --------------------------- residual layers -----------------------------
    def conv3x3(xf, widx, masks, wo):
        """3x3/s1/p1 conv of f32 rows `xf` with stacked weight index `widx`."""
        acc = None
        for (a, b), mk in masks.items():
            src = xf if (a, b) == (0, 0) else _shift_rows(xf, a * wo + b) * mk
            t = (a + 1) * 3 + (b + 1)
            part = jnp.dot(src.astype(jnp.bfloat16),
                           w3_ref[widx, t * c:(t + 1) * c, :],
                           preferred_element_type=jnp.float32)
            acc = part if acc is None else acc + part
        return acc

    def block_s1(xf, widx, masks, wo):
        """Stride-1 basic block: conv-bn-relu, conv-bn, +identity, relu."""
        y = jnp.maximum(conv3x3(xf, widx, masks, wo) + b3_ref[widx], 0.0)
        y = conv3x3(y, widx + 1, masks, wo) + b3_ref[widx + 1]
        return jnp.maximum(y + xf, 0.0)

    def block_down(xf, widx, dsidx, sel, masks_in, wo_in, masks_out, wo_out):
        """Downsampling block: 3x3/s2 conv1 == stride-1 conv at the input
        geometry + even-row selection; 1x1/s2 projection on the identity."""
        y = conv3x3(xf, widx, masks_in, wo_in)
        y = jnp.dot(sel, y.astype(jnp.bfloat16),
                    preferred_element_type=jnp.float32) + b3_ref[widx]
        y = jnp.maximum(y, 0.0)
        y = conv3x3(y, widx + 1, masks_out, wo_out) + b3_ref[widx + 1]
        xds = jnp.dot(sel, xf.astype(jnp.bfloat16),
                      preferred_element_type=jnp.float32).astype(jnp.bfloat16)
        idn = jnp.dot(xds, wd_ref[dsidx],
                      preferred_element_type=jnp.float32) + bd_ref[dsidx]
        return jnp.maximum(y + idn, 0.0)

    # per-geometry tap masks, built once and shared by every conv at that size
    hw1, hw2, hw3, hw4 = hw0 // 2, hw0 // 4, hw0 // 8, hw0 // 16
    m8 = _conv_masks(n_img * hw1 * hw1, hw1, hw1)
    m4 = _conv_masks(n_img * hw2 * hw2, hw2, hw2)
    m2 = _conv_masks(n_img * hw3 * hw3, hw3, hw3)
    m1 = _conv_masks(n_img * hw4 * hw4, hw4, hw4)

    x = block_s1(x, 0, m8, hw1)                                  # layer1
    x = block_s1(x, 2, m8, hw1)
    x1_ref[...] = x

    x = block_down(x, 4, 0, s2_ref[...], m8, hw1, m4, hw2)       # layer2
    x = block_s1(x, 6, m4, hw2)
    x2_ref[...] = x

    x = block_down(x, 8, 1, s3_ref[...], m4, hw2, m2, hw3)       # layer3
    x = block_s1(x, 10, m2, hw3)
    x3_ref[...] = x

    x = block_down(x, 12, 2, s4_ref[...], m2, hw3, m1, hw4)      # layer4
    x = block_s1(x, 14, m1, hw4)
    x4_ref[...] = x


# -------------------------------- JAX glue ---------------------------------- #

def _im2col(x_nhwc, kh, kw, stride, pad):
    """Conv patches: (N*Ho*Wo, kh*kw*C), (kh, kw) major / channel minor."""
    x = jnp.pad(x_nhwc, ((0, 0), (pad, pad), (pad, pad), (0, 0)))
    N, Hp, Wp, C = x.shape
    Ho = (Hp - kh) // stride + 1
    Wo = (Wp - kw) // stride + 1
    cols = [x[:, i:i + stride * Ho:stride, j:j + stride * Wo:stride, :]
            for i in range(kh) for j in range(kw)]
    patches = jnp.stack(cols, axis=3)                    # (N, Ho, Wo, kh*kw, C)
    return patches.reshape(N * Ho * Wo, kh * kw * C), (N, Ho, Wo)


def _stride2_select(n, hw, dtype=jnp.bfloat16):
    """One-hot (n*(hw/2)^2, n*hw^2) matrix picking rows (img, 2*ho, 2*wo) of a
    row-major (img, h, w) flattened activation -- a stride-2 spatial subsample
    expressed as a matmul (maxpool subsample, 3x3/s2 convs, 1x1/s2 proj)."""
    ho = hw // 2
    r = jnp.arange(n * ho * ho, dtype=jnp.int32)
    ni, rem = r // (ho * ho), r % (ho * ho)
    hi, wi = rem // ho, rem % ho
    src = ni * hw * hw + 2 * hi * hw + 2 * wi
    return (src[:, None] == jnp.arange(n * hw * hw, dtype=jnp.int32)[None, :]
            ).astype(dtype)


def _bcast_spec(shape):
    nd = len(shape)
    return pl.BlockSpec(shape, lambda *_, nd=nd: (0,) * nd)


def fpn_encoder_forward(params, x_nchw):
    x = jnp.transpose(x_nchw, (0, 2, 3, 1)).astype(jnp.float32)  # NCHW -> NHWC
    n = x.shape[0]
    patches, (_, h0, w0) = _im2col(x, 7, 7, 2, 3)
    assert h0 == w0 and h0 % 16 == 0
    k_pad = params["stem_w"].shape[0]
    patches = jnp.pad(patches, ((0, 0), (0, k_pad - patches.shape[1])))
    patches = patches.astype(jnp.bfloat16)

    sels = [_stride2_select(n, h0 // s) for s in (1, 2, 4, 8)]
    m0 = n * h0 * w0
    out_shape = [jax.ShapeDtypeStruct((m0, C_PAD), jnp.float32),
                 jax.ShapeDtypeStruct((m0 // 4, C_PAD), jnp.float32),
                 jax.ShapeDtypeStruct((m0 // 16, C_PAD), jnp.float32),
                 jax.ShapeDtypeStruct((m0 // 64, C_PAD), jnp.float32),
                 jax.ShapeDtypeStruct((m0 // 256, C_PAD), jnp.float32)]
    args = [patches, params["stem_w"], params["stem_b"], *sels,
            params["w3"], params["b3"], params["wd"], params["bd"]]

    outs = pl.pallas_call(
        functools.partial(_fused_encoder_kernel, n_img=n, hw0=h0),
        grid=(1,),
        in_specs=[_bcast_spec(a.shape) for a in args],
        out_specs=[_bcast_spec(s.shape) for s in out_shape],
        out_shape=out_shape,
        compiler_params=pltpu.CompilerParams(
            dimension_semantics=("arbitrary",),
            vmem_limit_bytes=48 * 1024 * 1024),
    )(*args)
    x0r, x1r, x2r, x3r, x4r = outs

    ch = params["channels"]

    def to_nchw(rows, hw, cname):          # strip channel padding, to NCHW
        t = rows.reshape(n, hw, hw, C_PAD)[..., :ch[cname]]
        return jnp.transpose(t, (0, 3, 1, 2))

    return (to_nchw(x4r, h0 // 16, "x4"), to_nchw(x3r, h0 // 8, "x3"),
            to_nchw(x2r, h0 // 4, "x2"), to_nchw(x1r, h0 // 2, "x1"),
            to_nchw(x0r, h0, "x0"))


# ---------------------- deterministic parameter setup ----------------------- #

def make_conv_bn(key, cin, cout, kh, kw, cin_pad):
    """Conv + eval-mode BN; BN scale folded into channel-padded HWIO weights."""
    k1, k2, k3, k4, k5 = jax.random.split(key, 5)
    w = 0.1 * jax.random.normal(k1, (cout, cin, kh, kw), jnp.float32)
    gamma = 1.0 + 0.1 * jax.random.normal(k2, (cout,), jnp.float32)
    beta = 0.1 * jax.random.normal(k3, (cout,), jnp.float32)
    mean = 0.1 * jax.random.normal(k4, (cout,), jnp.float32)
    var = 1.0 + 0.1 * jax.random.uniform(k5, (cout,), jnp.float32)
    scale = gamma / jnp.sqrt(var + 1e-5)
    bias = beta - mean * scale
    w_hwio = jnp.transpose(w, (2, 3, 1, 0)) * scale
    w_pad = jnp.zeros((kh, kw, cin_pad, C_PAD), jnp.float32)
    w_pad = w_pad.at[:, :, :cin, :cout].set(w_hwio)
    b_pad = jnp.zeros((1, C_PAD), jnp.float32).at[0, :cout].set(bias)
    return w_pad, b_pad


def make_encoder_params(key, base=16):
    keys = jax.random.split(key, 16)
    stem_hwio, stem_b = make_conv_bn(keys[0], 3, base, 7, 7, cin_pad=3)
    stem_kpad = ((7 * 7 * 3 + 127) // 128) * 128
    stem_flat = stem_hwio.reshape(7 * 7 * 3, C_PAD)
    stem_flat = jnp.pad(stem_flat, ((0, stem_kpad - stem_flat.shape[0]), (0, 0)))

    chans = [base, base, 2 * base, 4 * base, 8 * base]
    w3_list, b3_list, wd_list, bd_list, ref_layers = [], [], [], [], []
    ki = 1
    for li, (cin, cout) in enumerate(zip(chans[:-1], chans[1:]), start=1):
        stride = 1 if li == 1 else 2
        layer_ref = []
        for bi in range(2):
            s = stride if bi == 0 else 1
            c_in = cin if bi == 0 else cout
            bkeys = jax.random.split(keys[ki], 3)
            ki += 1
            w1, b1 = make_conv_bn(bkeys[0], c_in, cout, 3, 3, cin_pad=C_PAD)
            w2, b2 = make_conv_bn(bkeys[1], cout, cout, 3, 3, cin_pad=C_PAD)
            w3_list += [w1.reshape(9 * C_PAD, C_PAD), w2.reshape(9 * C_PAD, C_PAD)]
            b3_list += [b1, b2]
            blk = dict(w1=w1, b1=b1, w2=w2, b2=b2, stride=s, ds=None)
            if s != 1 or c_in != cout:
                wd, bd = make_conv_bn(bkeys[2], c_in, cout, 1, 1, cin_pad=C_PAD)
                wd_list.append(wd.reshape(C_PAD, C_PAD))
                bd_list.append(bd)
                blk["ds"] = (wd, bd)
            layer_ref.append(blk)
        ref_layers.append(layer_ref)

    return dict(
        stem_w=stem_flat.astype(jnp.bfloat16), stem_b=stem_b,
        w3=jnp.stack(w3_list).astype(jnp.bfloat16),        # (16, 1152, 128)
        b3=jnp.stack(b3_list),                             # (16, 1, 128)
        wd=jnp.stack(wd_list).astype(jnp.bfloat16),        # (3, 128, 128)
        bd=jnp.stack(bd_list),                             # (3, 1, 128)
        channels=dict(x0=base, x1=chans[1], x2=chans[2], x3=chans[3],
                      x4=chans[4]),
        ref=dict(stem=(stem_hwio, stem_b), layers=ref_layers),
    )


# --------------------- pure-JAX f32 reference (validation) ------------------ #

def _conv_ref(x, w_hwio, b, stride, pad):
    y = lax.conv_general_dilated(
        x, w_hwio, window_strides=(stride, stride),
        padding=((pad, pad), (pad, pad)),
        dimension_numbers=("NHWC", "HWIO", "NHWC"))
    return y + b.reshape(1, 1, 1, -1)


def fpn_encoder_reference(params, x_nchw):
    ref = params["ref"]
    x = jnp.transpose(x_nchw, (0, 2, 3, 1)).astype(jnp.float32)
    w, b = ref["stem"]
    x0 = jnp.maximum(_conv_ref(x, w, b, 2, 3), 0.0)
    h = lax.reduce_window(x0, -jnp.inf, lax.max, (1, 3, 3, 1), (1, 2, 2, 1),
                          ((0, 0), (1, 1), (1, 1), (0, 0)))
    feats = []
    for layer in ref["layers"]:
        for blk in layer:
            y = jnp.maximum(_conv_ref(h, blk["w1"], blk["b1"], blk["stride"], 1), 0.0)
            y = _conv_ref(y, blk["w2"], blk["b2"], 1, 1)
            if blk["ds"] is not None:
                wd, bd = blk["ds"]
                idn = _conv_ref(h, wd, bd, blk["stride"], 0)
            else:
                idn = h
            h = jnp.maximum(y + idn, 0.0)
        feats.append(h)
    x1, x2, x3, x4 = feats
    ch = params["channels"]

    def to_nchw(t, c):
        return jnp.transpose(t[..., :c], (0, 3, 1, 2))

    return (to_nchw(x4, ch["x4"]), to_nchw(x3, ch["x3"]), to_nchw(x2, ch["x2"]),
            to_nchw(x1, ch["x1"]), to_nchw(x0, ch["x0"]))


# ---------------------------------- main ------------------------------------ #

if __name__ == "__main__":
    _roll_like_jnp()          # resolve pltpu.roll direction before tracing

    key = jax.random.PRNGKey(0)
    k_param, k_x = jax.random.split(key)
    params = make_encoder_params(k_param, base=16)
    x = jax.random.normal(k_x, (2, 3, 32, 32), jnp.float32)       # NCHW input

    fwd = jax.jit(functools.partial(fpn_encoder_forward, params))
    outs = jax.block_until_ready(fwd(x))

    expected = [(2, 128, 1, 1), (2, 64, 2, 2), (2, 32, 4, 4),
                (2, 16, 8, 8), (2, 16, 16, 16)]
    assert [tuple(o.shape) for o in outs] == expected, \
        [tuple(o.shape) for o in outs]
    assert all(bool(jnp.all(jnp.isfinite(o))) for o in outs)

    # Pure-JAX f32 reference with the same folded-BN params; the kernel feeds
    # the MXU bf16, so compare with a loose (inference-grade) tolerance.
    refs = jax.block_until_ready(
        jax.jit(functools.partial(fpn_encoder_reference, params))(x))
    for o, r in zip(outs, refs):
        err = float(jnp.max(jnp.abs(o - r)))
        scale = float(jnp.max(jnp.abs(r)))
        assert err <= 0.08 * scale + 1e-2, (err, scale)

    print("KERNEL_OK")
</pallas_src>

<mosaic_0001>
module attributes {stable_mosaic.version = 11 : i64} {
  func.func @k(%arg0: memref<8x128xf32, #tpu.memory_space<vmem>>, %arg1: memref<8x128xf32, #tpu.memory_space<vmem>>) attributes {dimension_semantics = [], scalar_prefetch = 0 : i64, scratch_operands = 0 : i64, tpu.core_type = #tpu.core_type<tc>} {
    %c0 = arith.constant 0 : index
    %c0_0 = arith.constant 0 : index
    %0 = vector.load %arg0[%c0, %c0_0] : memref<8x128xf32, #tpu.memory_space<vmem>>, vector<8x128xf32>
    %c1_i32 = arith.constant 1 : i32
    %1 = tpu.dynamic_rotate %0 by %c1_i32 dim 0 : vector<8x128xf32>, i32 -> vector<8x128xf32>
    %c0_1 = arith.constant 0 : index
    %c0_2 = arith.constant 0 : index
    %2 = vector.load %arg1[%c0_1, %c0_2] : memref<8x128xf32, #tpu.memory_space<vmem>>, vector<8x128xf32>
    tpu.vector_store %arg1[%c0_1, %c0_2], %1 {strides = array<i32>} : memref<8x128xf32, #tpu.memory_space<vmem>>, vector<8x128xf32>,
    return
  }
}

</mosaic_0001>

<bundles_post_ra>
// kernel: tpu_custom_call.1
= control target key start
LH: loop header
LB: loop body
LE: loop exit
PB: predicated region body
PF: predicated region fallthrough
CT: control target
= control target key end

     0   :  { %6 = vsyncpa [#allocation3], 0  ;;  %s115_s0 = inlined_call_operand.hbm [shape: f32[8,128], index: 0, kind: input, shape index: {}]   ;;  %s116_s1 = inlined_call_operand.hbm [shape: f32[8,128], index: 1, kind: output, shape index: {}]  }
   0x1   :  { %7 = vsyncpa [#allocation4], 0  ;;  %s13_s8 = sshll.u32 %s115_s0, 4  ;;  %s97_s9 = smov [#allocation2]   ;;  %s14_s8 = int_to_ptr.hbm [resolvable:$true] %s13_s8 }
   0x2   :  { %s15_s10 = sshll.u32 %s97_s9, 4  ;;  %s16_s10 = int_to_ptr.vmem [resolvable:$true] %s15_s10 }
   0x3   :  { %18 = dma.hbm_to_vmem [thread:$0]  %s14_s8, 128, %s16_s10, [#allocation3]  }
   0x4   :  { %93 = dma.done.wait [#allocation3], 128  }
   0x5   :  { %94 = vsyncadd [#allocation3], 4294967168  ;;  %s98_s11 = smov [#allocation5]   ;;  %s33_s15 = sshll.u32 %s116_s1, 4  ;;  %v23_v0 = vld [vmem:[#allocation2] sm:$0xff]  ;;  %s34_s15 = int_to_ptr.hbm [resolvable:$true] %s33_s15 }
   0x6   :  { %s31_s12 = sshll.u32 %s98_s11, 4  ;;  %v24_v1 = vrot.slane %v23_v0, 7  ;;  %s32_s12 = int_to_ptr.vmem [resolvable:$true] %s31_s12 }
   0x8   :  { %25 = vst [vmem:[#allocation5] sm:$0xff] %v24_v1 }
   0x9   :  { %36 = dma.vmem_to_hbm [thread:$0]  %s32_s12, 128, %s34_s15, [#allocation4]  }
   0xa   :  { %95 = dma.done.wait [#allocation4], 128  }
   0xb   :  { %96 = vsyncadd [#allocation4], 4294967168 }
   0xc   :  { %41 = vsyncpa [#allocation3], 1 }
   0xd   :  { %42 = vsyncpa [#allocation4], 1 }

</bundles_post_ra>
